<compile_context>
chip_gen: v5e
topology: v5e:2x2
jax: 0.10.0
libtpu: 0.0.40
codegen_flags: <defaults>
</compile_context>

<pallas_src>
import functools

import jax
import jax.numpy as jnp
from jax import lax
from jax.experimental import pallas as pl
from jax.experimental.pallas import tpu as pltpu

EPS = 1e-5   # PyTorch BatchNorm1d default eps
TAPS = 7     # widest pathway kernel; k=3 / k=5 weights are zero-padded to 7 taps


def _msconv_kernel(xe_ref, xo_ref, w_ref, b_ref, o_ref, xce_ref, xco_ref, *, nb):
    """One grid step = nb batch elements, all three pathways fused."""
    xe = xe_ref[...]                        # (nb, C, P)  == x[..., 0::2]
    xo = xo_ref[...]                        # (nb, C, P)  == x[..., 1::2]
    C, P = xe.shape[1], xe.shape[2]

    # Zero-fill the im2col scratches; the zero lanes realize the conv's
    # zero-padding halo (padding=3 of the widest kernel) in-kernel.
    xce_ref[...] = jnp.zeros_like(xce_ref)
    xco_ref[...] = jnp.zeros_like(xco_ref)

    # Polyphase im2col.  With xe[q] = x[2q], xo[q] = x[2q+1]:
    #   even outputs y[2p]   need x[2p   + k - 3], k = 0..6
    #   odd  outputs y[2p+1] need x[2p+1 + k - 3], k = 0..6
    # and each tap is a whole-lane shift of xe or xo:  (phase, shift) per tap k.
    even_src = [(xo, -2), (xe, -1), (xo, -1), (xe, 0), (xo, 0), (xe, 1), (xo, 1)]
    odd_src = [(xe, -1), (xo, -1), (xe, 0), (xo, 0), (xe, 1), (xo, 1), (xe, 2)]

    def fill(ref, src):
        for k, (z, s) in enumerate(src):
            rows = slice(k * C, (k + 1) * C)
            if s == 0:                                  # dest[p] = z[p]
                ref[:, rows, :] = z
            elif s > 0:                                 # dest[p] = z[p + s]
                ref[:, rows, 0:P - s] = z[:, :, s:]
            else:                                       # dest[p] = z[p + s], s < 0
                ref[:, rows, (-s):P] = z[:, :, :P + s]

    fill(xce_ref, even_src)
    fill(xco_ref, odd_src)

    w = w_ref[...]                          # (3F, 7C)  BN-folded, 3 pathways stacked
    bias = b_ref[...]                       # (3F, 1)   BN-folded biases

    # One fused matmul per output phase per batch element replaces the previous
    # 15 K-deep tap matmuls and the O(L^2) selection-matmul pooling.
    for b in range(nb):                     # static unroll; nb is small
        ye = jnp.dot(w, xce_ref[b], preferred_element_type=jnp.float32)
        yo = jnp.dot(w, xco_ref[b], preferred_element_type=jnp.float32)
        ye = jnp.maximum(ye + bias, 0.0)    # Conv bias + BN folded in; ReLU
        yo = jnp.maximum(yo + bias, 0.0)
        # MaxPool1d(kernel=2, stride=2): out[p] = max(y[2p], y[2p+1]).
        o_ref[b] = jnp.maximum(ye, yo)


def _fold_bn_and_pack(params, C, F):
    """Fold eval-mode BatchNorm1d (+ conv bias) into the conv weights and pack the
    three pathways into one (3F, TAPS*C) matrix (cols: tap-major, channel-minor)
    plus a (3F, 1) bias."""
    ws, bs = [], []
    for i, K in ((1, 3), (2, 5), (3, 7)):
        w = params[f"w{i}"].astype(jnp.float32)                       # (F, C, K)
        scale = params[f"gamma{i}"].astype(jnp.float32) * lax.rsqrt(
            params[f"var{i}"].astype(jnp.float32) + EPS)
        b = (params[f"b{i}"] - params[f"mean{i}"]) * scale + params[f"beta{i}"]
        w = w * scale[:, None, None]
        off = (TAPS - K) // 2          # center kernel K inside the 7-tap stencil
        w7 = jnp.zeros((F, C, TAPS), jnp.float32).at[:, :, off:off + K].set(w)
        ws.append(jnp.transpose(w7, (0, 2, 1)).reshape(F, TAPS * C))
        bs.append(b.astype(jnp.float32))
    return jnp.concatenate(ws, axis=0), jnp.concatenate(bs, axis=0)[:, None]


def _pick_batch_block(N, C, P, F):
    """Batch elements per grid step: large enough to amortize the ~0.35us per-step
    pipeline overhead, small enough to stay far below v5e's 16 MiB default scoped
    VMEM limit (and v7x's 64 MiB physical VMEM), keeping >=2 grid steps when N>1
    so v7x's two TensorCores both get work."""
    def vmem_bytes(nb):
        io = 2 * (2 * nb * C * P + nb * 3 * F * P) * 4     # double-buffered in/out
        const = (3 * F * TAPS * C + 3 * F) * 4             # weights + bias
        scratch = 2 * nb * TAPS * C * P * 4                # im2col scratches
        live = 4 * 3 * F * P * 4                           # ye/yo activations
        return 2 * (io + const + scratch + live)           # 2x headroom
    budget = 8 * 1024 * 1024
    cap = N if N == 1 else max(1, N // 2)
    nb = 1
    for cand in range(1, N + 1):
        if N % cand == 0 and cand <= cap and vmem_bytes(cand) <= budget:
            nb = cand
    return nb


def multi_scale_convnet(x, params):
    """x: (N, C, L) f32  ->  (N, 3*F, L // 2) f32 (PyTorch MultiScaleConvNet fwd)."""
    N, C, L = x.shape
    if L % 2:
        raise ValueError("sequence length must be even (MaxPool1d(kernel=2, stride=2))")
    F = params["w1"].shape[0]
    P = L // 2

    w_all, b_all = _fold_bn_and_pack(params, C, F)        # (3F, 7C), (3F, 1)

    # Polyphase split of the input (even / odd samples).  This replaces the
    # previous host-side jnp.pad halo and lets the kernel fuse MaxPool1d into the
    # conv matmul with no O(L^2) selection matrices or strided lane access.
    x = x.astype(jnp.float32)
    xe = x[:, :, 0::2]
    xo = x[:, :, 1::2]

    nb = _pick_batch_block(N, C, P, F)
    grid = (N // nb,)
    kernel = functools.partial(_msconv_kernel, nb=nb)

    return pl.pallas_call(
        kernel,
        out_shape=jax.ShapeDtypeStruct((N, 3 * F, P), jnp.float32),
        grid=grid,
        in_specs=[
            pl.BlockSpec((nb, C, P), lambda b: (b, 0, 0)),       # xe (batch tiled)
            pl.BlockSpec((nb, C, P), lambda b: (b, 0, 0)),       # xo (batch tiled)
            pl.BlockSpec((3 * F, TAPS * C), lambda b: (0, 0)),   # W  (VMEM resident)
            pl.BlockSpec((3 * F, 1), lambda b: (0, 0)),          # bias
        ],
        out_specs=pl.BlockSpec((nb, 3 * F, P), lambda b: (b, 0, 0)),
        scratch_shapes=[
            pltpu.VMEM((nb, TAPS * C, P), jnp.float32),          # even-phase im2col
            pltpu.VMEM((nb, TAPS * C, P), jnp.float32),          # odd-phase im2col
        ],
        compiler_params=pltpu.CompilerParams(
            dimension_semantics=("parallel",)),                  # megacore on v7x
    )(xe, xo, w_all, b_all)


def reference(x, params):
    """Pure-JAX reference (lax.conv, full f32) for correctness checking."""
    def pathway(i):
        w = params[f"w{i}"]
        pad = (w.shape[-1] - 1) // 2
        y = lax.conv_general_dilated(
            x, w, window_strides=(1,), padding=[(pad, pad)],
            dimension_numbers=("NCH", "OIH", "NCH"),
            precision=lax.Precision.HIGHEST)
        b, g, bt = params[f"b{i}"], params[f"gamma{i}"], params[f"beta{i}"]
        m, v = params[f"mean{i}"], params[f"var{i}"]
        y = y + b[None, :, None]
        y = (y - m[None, :, None]) * (g[None, :, None] *
                                      lax.rsqrt(v[None, :, None] + EPS)) + bt[None, :, None]
        y = jnp.maximum(y, 0.0)
        n, f, l = y.shape
        return jnp.max(y.reshape(n, f, l // 2, 2), axis=-1)

    return jnp.concatenate([pathway(1), pathway(2), pathway(3)], axis=1)


def init_params(key, c_in, filters):
    ks = jax.random.split(key, 3)
    params = {}
    for i, (K, kp) in enumerate(zip((3, 5, 7), ks), start=1):
        kk = jax.random.split(kp, 6)
        fan_in = c_in * K
        params[f"w{i}"] = jax.random.normal(kk[0], (filters, c_in, K), jnp.float32) / jnp.sqrt(fan_in)
        params[f"b{i}"] = 0.1 * jax.random.normal(kk[1], (filters,), jnp.float32)
        params[f"gamma{i}"] = 1.0 + 0.1 * jax.random.normal(kk[2], (filters,), jnp.float32)
        params[f"beta{i}"] = 0.1 * jax.random.normal(kk[3], (filters,), jnp.float32)
        params[f"mean{i}"] = 0.1 * jax.random.normal(kk[4], (filters,), jnp.float32)
        params[f"var{i}"] = 0.5 + jax.random.uniform(kk[5], (filters,), jnp.float32)
    return params


if __name__ == "__main__":
    batch, input_channels, seq_len, filters = 2, 4, 16, 32

    key = jax.random.PRNGKey(0)
    k_param, k_x = jax.random.split(key)
    params = init_params(k_param, input_channels, filters)
    x = jax.random.normal(k_x, (batch, input_channels, seq_len), jnp.float32)

    out = jax.block_until_ready(multi_scale_convnet(x, params))
    ref = jax.block_until_ready(reference(x, params))

    assert out.shape == (batch, 3 * filters, seq_len // 2), out.shape
    # Default MXU precision may round f32 operands to bf16 inside the matmul
    # (review: drop Precision.HIGHEST), so allow bf16-level differences against
    # the full-f32 reference; structural errors would be O(1).
    assert jnp.allclose(out, ref, atol=3e-2, rtol=3e-2), float(jnp.max(jnp.abs(out - ref)))

    print("KERNEL_OK")
</pallas_src>

<mosaic_0001>
module attributes {stable_mosaic.version = 11 : i64} {
  func.func @_msconv_kernel(%arg0: i32, %arg1: memref<1x4x8xf32, #tpu.memory_space<vmem>>, %arg2: memref<1x4x8xf32, #tpu.memory_space<vmem>>, %arg3: memref<96x28xf32, #tpu.memory_space<vmem>>, %arg4: memref<96x1xf32, #tpu.memory_space<vmem>>, %arg5: memref<1x96x8xf32, #tpu.memory_space<vmem>>, %arg6: memref<1x28x8xf32, #tpu.memory_space<vmem>>, %arg7: memref<1x28x8xf32, #tpu.memory_space<vmem>>) attributes {dimension_semantics = [#tpu.dimension_semantics<parallel>], iteration_bounds = array<i64: 2>, scalar_prefetch = 0 : i64, scratch_operands = 2 : i64, tpu.core_type = #tpu.core_type<tc>, window_params = [{transform_indices = @transform_0, window_bounds = array<i64: 1, 4, 8>}, {transform_indices = @transform_1, window_bounds = array<i64: 1, 4, 8>}, {pipeline_mode = #tpu.pipeline_mode<synchronous>, transform_indices = @transform_2, window_bounds = array<i64: 96, 28>}, {pipeline_mode = #tpu.pipeline_mode<synchronous>, transform_indices = @transform_3, window_bounds = array<i64: 96, 1>}, {transform_indices = @transform_4, window_bounds = array<i64: 1, 96, 8>}]} {
    %c0 = arith.constant 0 : index
    %c0_0 = arith.constant 0 : index
    %c0_1 = arith.constant 0 : index
    %0 = vector.load %arg1[%c0, %c0_0, %c0_1] : memref<1x4x8xf32, #tpu.memory_space<vmem>>, vector<1x4x8xf32>
    %c0_2 = arith.constant 0 : index
    %c0_3 = arith.constant 0 : index
    %c0_4 = arith.constant 0 : index
    %1 = vector.load %arg2[%c0_2, %c0_3, %c0_4] : memref<1x4x8xf32, #tpu.memory_space<vmem>>, vector<1x4x8xf32>
    %cst = arith.constant 0.000000e+00 : f32
    %2 = vector.broadcast %cst : f32 to vector<1x28x8xf32>
    %c0_5 = arith.constant 0 : index
    %c0_6 = arith.constant 0 : index
    %c0_7 = arith.constant 0 : index
    %3 = vector.load %arg6[%c0_5, %c0_6, %c0_7] : memref<1x28x8xf32, #tpu.memory_space<vmem>>, vector<1x28x8xf32>
    tpu.vector_store %arg6[%c0_5, %c0_6, %c0_7], %2 {strides = array<i32>} : memref<1x28x8xf32, #tpu.memory_space<vmem>>, vector<1x28x8xf32>,
    %cst_8 = arith.constant 0.000000e+00 : f32
    %4 = vector.broadcast %cst_8 : f32 to vector<1x28x8xf32>
    %c0_9 = arith.constant 0 : index
    %c0_10 = arith.constant 0 : index
    %c0_11 = arith.constant 0 : index
    %5 = vector.load %arg7[%c0_9, %c0_10, %c0_11] : memref<1x28x8xf32, #tpu.memory_space<vmem>>, vector<1x28x8xf32>
    tpu.vector_store %arg7[%c0_9, %c0_10, %c0_11], %4 {strides = array<i32>} : memref<1x28x8xf32, #tpu.memory_space<vmem>>, vector<1x28x8xf32>,
    %6 = vector.extract_strided_slice %1 {offsets = [0, 0, 0], sizes = [1, 4, 6], strides = [1, 1, 1]} : vector<1x4x8xf32> to vector<1x4x6xf32>
    %c0_12 = arith.constant 0 : index
    %c0_13 = arith.constant 0 : index
    %c2 = arith.constant 2 : index
    %7 = vector.load %arg6[%c0_12, %c0_13, %c2] : memref<1x28x8xf32, #tpu.memory_space<vmem>>, vector<1x4x6xf32>
    tpu.vector_store %arg6[%c0_12, %c0_13, %c2], %6 {strides = array<i32>} : memref<1x28x8xf32, #tpu.memory_space<vmem>>, vector<1x4x6xf32>,
    %8 = vector.extract_strided_slice %0 {offsets = [0, 0, 0], sizes = [1, 4, 7], strides = [1, 1, 1]} : vector<1x4x8xf32> to vector<1x4x7xf32>
    %c0_14 = arith.constant 0 : index
    %c4 = arith.constant 4 : index
    %c1 = arith.constant 1 : index
    %9 = vector.load %arg6[%c0_14, %c4, %c1] : memref<1x28x8xf32, #tpu.memory_space<vmem>>, vector<1x4x7xf32>
    tpu.vector_store %arg6[%c0_14, %c4, %c1], %8 {strides = array<i32>} : memref<1x28x8xf32, #tpu.memory_space<vmem>>, vector<1x4x7xf32>,
    %10 = vector.extract_strided_slice %1 {offsets = [0, 0, 0], sizes = [1, 4, 7], strides = [1, 1, 1]} : vector<1x4x8xf32> to vector<1x4x7xf32>
    %c0_15 = arith.constant 0 : index
    %c8 = arith.constant 8 : index
    %c1_16 = arith.constant 1 : index
    %11 = vector.load %arg6[%c0_15, %c8, %c1_16] : memref<1x28x8xf32, #tpu.memory_space<vmem>>, vector<1x4x7xf32>
    tpu.vector_store %arg6[%c0_15, %c8, %c1_16], %10 {strides = array<i32>} : memref<1x28x8xf32, #tpu.memory_space<vmem>>, vector<1x4x7xf32>,
    %c0_17 = arith.constant 0 : index
    %c12 = arith.constant 12 : index
    %c0_18 = arith.constant 0 : index
    %12 = vector.load %arg6[%c0_17, %c12, %c0_18] : memref<1x28x8xf32, #tpu.memory_space<vmem>>, vector<1x4x8xf32>
    tpu.vector_store %arg6[%c0_17, %c12, %c0_18], %0 {strides = array<i32>} : memref<1x28x8xf32, #tpu.memory_space<vmem>>, vector<1x4x8xf32>,
    %c0_19 = arith.constant 0 : index
    %c16 = arith.constant 16 : index
    %c0_20 = arith.constant 0 : index
    %13 = vector.load %arg6[%c0_19, %c16, %c0_20] : memref<1x28x8xf32, #tpu.memory_space<vmem>>, vector<1x4x8xf32>
    tpu.vector_store %arg6[%c0_19, %c16, %c0_20], %1 {strides = array<i32>} : memref<1x28x8xf32, #tpu.memory_space<vmem>>, vector<1x4x8xf32>,
    %14 = vector.extract_strided_slice %0 {offsets = [0, 0, 1], sizes = [1, 4, 7], strides = [1, 1, 1]} : vector<1x4x8xf32> to vector<1x4x7xf32>
    %c0_21 = arith.constant 0 : index
    %c20 = arith.constant 20 : index
    %c0_22 = arith.constant 0 : index
    %15 = vector.load %arg6[%c0_21, %c20, %c0_22] : memref<1x28x8xf32, #tpu.memory_space<vmem>>, vector<1x4x7xf32>
    tpu.vector_store %arg6[%c0_21, %c20, %c0_22], %14 {strides = array<i32>} : memref<1x28x8xf32, #tpu.memory_space<vmem>>, vector<1x4x7xf32>,
    %16 = vector.extract_strided_slice %1 {offsets = [0, 0, 1], sizes = [1, 4, 7], strides = [1, 1, 1]} : vector<1x4x8xf32> to vector<1x4x7xf32>
    %c0_23 = arith.constant 0 : index
    %c24 = arith.constant 24 : index
    %c0_24 = arith.constant 0 : index
    %17 = vector.load %arg6[%c0_23, %c24, %c0_24] : memref<1x28x8xf32, #tpu.memory_space<vmem>>, vector<1x4x7xf32>
    tpu.vector_store %arg6[%c0_23, %c24, %c0_24], %16 {strides = array<i32>} : memref<1x28x8xf32, #tpu.memory_space<vmem>>, vector<1x4x7xf32>,
    %18 = vector.extract_strided_slice %0 {offsets = [0, 0, 0], sizes = [1, 4, 7], strides = [1, 1, 1]} : vector<1x4x8xf32> to vector<1x4x7xf32>
    %c0_25 = arith.constant 0 : index
    %c0_26 = arith.constant 0 : index
    %c1_27 = arith.constant 1 : index
    %19 = vector.load %arg7[%c0_25, %c0_26, %c1_27] : memref<1x28x8xf32, #tpu.memory_space<vmem>>, vector<1x4x7xf32>
    tpu.vector_store %arg7[%c0_25, %c0_26, %c1_27], %18 {strides = array<i32>} : memref<1x28x8xf32, #tpu.memory_space<vmem>>, vector<1x4x7xf32>,
    %20 = vector.extract_strided_slice %1 {offsets = [0, 0, 0], sizes = [1, 4, 7], strides = [1, 1, 1]} : vector<1x4x8xf32> to vector<1x4x7xf32>
    %c0_28 = arith.constant 0 : index
    %c4_29 = arith.constant 4 : index
    %c1_30 = arith.constant 1 : index
    %21 = vector.load %arg7[%c0_28, %c4_29, %c1_30] : memref<1x28x8xf32, #tpu.memory_space<vmem>>, vector<1x4x7xf32>
    tpu.vector_store %arg7[%c0_28, %c4_29, %c1_30], %20 {strides = array<i32>} : memref<1x28x8xf32, #tpu.memory_space<vmem>>, vector<1x4x7xf32>,
    %c0_31 = arith.constant 0 : index
    %c8_32 = arith.constant 8 : index
    %c0_33 = arith.constant 0 : index
    %22 = vector.load %arg7[%c0_31, %c8_32, %c0_33] : memref<1x28x8xf32, #tpu.memory_space<vmem>>, vector<1x4x8xf32>
    tpu.vector_store %arg7[%c0_31, %c8_32, %c0_33], %0 {strides = array<i32>} : memref<1x28x8xf32, #tpu.memory_space<vmem>>, vector<1x4x8xf32>,
    %c0_34 = arith.constant 0 : index
    %c12_35 = arith.constant 12 : index
    %c0_36 = arith.constant 0 : index
    %23 = vector.load %arg7[%c0_34, %c12_35, %c0_36] : memref<1x28x8xf32, #tpu.memory_space<vmem>>, vector<1x4x8xf32>
    tpu.vector_store %arg7[%c0_34, %c12_35, %c0_36], %1 {strides = array<i32>} : memref<1x28x8xf32, #tpu.memory_space<vmem>>, vector<1x4x8xf32>,
    %24 = vector.extract_strided_slice %0 {offsets = [0, 0, 1], sizes = [1, 4, 7], strides = [1, 1, 1]} : vector<1x4x8xf32> to vector<1x4x7xf32>
    %c0_37 = arith.constant 0 : index
    %c16_38 = arith.constant 16 : index
    %c0_39 = arith.constant 0 : index
    %25 = vector.load %arg7[%c0_37, %c16_38, %c0_39] : memref<1x28x8xf32, #tpu.memory_space<vmem>>, vector<1x4x7xf32>
    tpu.vector_store %arg7[%c0_37, %c16_38, %c0_39], %24 {strides = array<i32>} : memref<1x28x8xf32, #tpu.memory_space<vmem>>, vector<1x4x7xf32>,
    %26 = vector.extract_strided_slice %1 {offsets = [0, 0, 1], sizes = [1, 4, 7], strides = [1, 1, 1]} : vector<1x4x8xf32> to vector<1x4x7xf32>
    %c0_40 = arith.constant 0 : index
    %c20_41 = arith.constant 20 : index
    %c0_42 = arith.constant 0 : index
    %27 = vector.load %arg7[%c0_40, %c20_41, %c0_42] : memref<1x28x8xf32, #tpu.memory_space<vmem>>, vector<1x4x7xf32>
    tpu.vector_store %arg7[%c0_40, %c20_41, %c0_42], %26 {strides = array<i32>} : memref<1x28x8xf32, #tpu.memory_space<vmem>>, vector<1x4x7xf32>,
    %28 = vector.extract_strided_slice %0 {offsets = [0, 0, 2], sizes = [1, 4, 6], strides = [1, 1, 1]} : vector<1x4x8xf32> to vector<1x4x6xf32>
    %c0_43 = arith.constant 0 : index
    %c24_44 = arith.constant 24 : index
    %c0_45 = arith.constant 0 : index
    %29 = vector.load %arg7[%c0_43, %c24_44, %c0_45] : memref<1x28x8xf32, #tpu.memory_space<vmem>>, vector<1x4x6xf32>
    tpu.vector_store %arg7[%c0_43, %c24_44, %c0_45], %28 {strides = array<i32>} : memref<1x28x8xf32, #tpu.memory_space<vmem>>, vector<1x4x6xf32>,
    %c0_46 = arith.constant 0 : index
    %c0_47 = arith.constant 0 : index
    %30 = vector.load %arg3[%c0_46, %c0_47] : memref<96x28xf32, #tpu.memory_space<vmem>>, vector<96x28xf32>
    %c0_48 = arith.constant 0 : index
    %c0_49 = arith.constant 0 : index
    %31 = vector.load %arg4[%c0_48, %c0_49] : memref<96x1xf32, #tpu.memory_space<vmem>>, vector<96x1xf32>
    %c0_50 = arith.constant 0 : index
    %c0_51 = arith.constant 0 : index
    %c0_52 = arith.constant 0 : index
    %32 = vector.load %arg6[%c0_50, %c0_51, %c0_52] : memref<1x28x8xf32, #tpu.memory_space<vmem>>, vector<1x28x8xf32>
    %33 = vector.shape_cast %32 : vector<1x28x8xf32> to vector<28x8xf32>
    %cst_53 = arith.constant dense<0.000000e+00> : vector<96x8xf32>
    %34 = tpu.matmul %30, %33, %cst_53 {dimension_numbers = #tpu.dot_dimension_numbers<[1], [0], [0], [1], [0, 0, 1, 1], [], []>} : vector<96x28xf32>, vector<28x8xf32>, vector<96x8xf32> -> vector<96x8xf32>
    %c0_54 = arith.constant 0 : index
    %c0_55 = arith.constant 0 : index
    %c0_56 = arith.constant 0 : index
    %35 = vector.load %arg7[%c0_54, %c0_55, %c0_56] : memref<1x28x8xf32, #tpu.memory_space<vmem>>, vector<1x28x8xf32>
    %36 = vector.shape_cast %35 : vector<1x28x8xf32> to vector<28x8xf32>
    %cst_57 = arith.constant dense<0.000000e+00> : vector<96x8xf32>
    %37 = tpu.matmul %30, %36, %cst_57 {dimension_numbers = #tpu.dot_dimension_numbers<[1], [0], [0], [1], [0, 0, 1, 1], [], []>} : vector<96x28xf32>, vector<28x8xf32>, vector<96x8xf32> -> vector<96x8xf32>
    %38 = vector.broadcast %31 : vector<96x1xf32> to vector<96x8xf32>
    %39 = arith.addf %34, %38 : vector<96x8xf32>
    %cst_58 = arith.constant 0.000000e+00 : f32
    %40 = vector.broadcast %cst_58 : f32 to vector<96x8xf32>
    %41 = arith.maximumf %39, %40 : vector<96x8xf32>
    %42 = vector.broadcast %31 : vector<96x1xf32> to vector<96x8xf32>
    %43 = arith.addf %37, %42 : vector<96x8xf32>
    %cst_59 = arith.constant 0.000000e+00 : f32
    %44 = vector.broadcast %cst_59 : f32 to vector<96x8xf32>
    %45 = arith.maximumf %43, %44 : vector<96x8xf32>
    %46 = arith.maximumf %41, %45 : vector<96x8xf32>
    %c0_60 = arith.constant 0 : index
    %c0_61 = arith.constant 0 : index
    %c0_62 = arith.constant 0 : index
    %47 = vector.load %arg5[%c0_60, %c0_61, %c0_62] : memref<1x96x8xf32, #tpu.memory_space<vmem>>, vector<1x96x8xf32>
    %48 = vector.shape_cast %47 : vector<1x96x8xf32> to vector<96x8xf32>
    %49 = vector.shape_cast %46 : vector<96x8xf32> to vector<1x96x8xf32>
    tpu.vector_store %arg5[%c0_60, %c0_61, %c0_62], %49 {strides = array<i32>} : memref<1x96x8xf32, #tpu.memory_space<vmem>>, vector<1x96x8xf32>,
    return
  }
  func.func @transform_0(%arg0: i32) -> (i32, i32, i32) {
    %c0_i32 = arith.constant 0 : i32
    %c0_i32_0 = arith.constant 0 : i32
    %c0_i32_1 = arith.constant 0 : i32
    return %arg0, %c0_i32, %c0_i32_0 : i32, i32, i32
  }
  func.func @transform_1(%arg0: i32) -> (i32, i32, i32) {
    %c0_i32 = arith.constant 0 : i32
    %c0_i32_0 = arith.constant 0 : i32
    %c0_i32_1 = arith.constant 0 : i32
    return %arg0, %c0_i32, %c0_i32_0 : i32, i32, i32
  }
  func.func @transform_2(%arg0: i32) -> (i32, i32) {
    %c0_i32 = arith.constant 0 : i32
    %c0_i32_0 = arith.constant 0 : i32
    %c0_i32_1 = arith.constant 0 : i32
    return %c0_i32, %c0_i32_0 : i32, i32
  }
  func.func @transform_3(%arg0: i32) -> (i32, i32) {
    %c0_i32 = arith.constant 0 : i32
    %c0_i32_0 = arith.constant 0 : i32
    %c0_i32_1 = arith.constant 0 : i32
    return %c0_i32, %c0_i32_0 : i32, i32
  }
  func.func @transform_4(%arg0: i32) -> (i32, i32, i32) {
    %c0_i32 = arith.constant 0 : i32
    %c0_i32_0 = arith.constant 0 : i32
    %c0_i32_1 = arith.constant 0 : i32
    return %arg0, %c0_i32, %c0_i32_0 : i32, i32, i32
  }
}

</mosaic_0001>

<bundles_post_ra>
// kernel: tpu_custom_call.1
= control target key start
LH: loop header
LB: loop body
LE: loop exit
PB: predicated region body
PF: predicated region fallthrough
CT: control target
= control target key end

     0   :  { %s720_s15 = smov 0   ;;  %s894_s0 = inlined_call_operand.vmem [shape: f32[2,4,8], index: 0, kind: input, shape index: {}]   ;;  %s895_s1 = inlined_call_operand.vmem [shape: f32[2,4,8], index: 1, kind: input, shape index: {}]   ;;  %s896_s2 = inlined_call_operand.vmem [shape: f32[96,28], index: 2, kind: input, shape index: {}]   ;;  %s897_s3 = inlined_call_operand.vmem [shape: f32[96,1], index: 3, kind: input, shape index: {}]   ;;  %s898_s4 = inlined_call_operand.vmem [shape: f32[2,96,8], index: 4, kind: output, shape index: {}]  }
   0x1 LB: > { %s619_s16 = sadd.s32 4294967295, %s687_s15   ;;  %p623_p0 = scmp.ge.s32.totalorder %s687_s15, 1  ;;  %s687_s15 = sphi %s720_s15, %s14_s15  }
   0x2   : > { %p170_p1 = scmp.lt.s32.totalorder %s687_s15, 3 }
   0x4   : > { %p171_p2 = pnand %p623_p0, %p170_p1 }
   0x5   : > { %p199_p3 = scmp.lt.s32.totalorder (!%p171_p2), %s619_s16, 1  ;;  %s690_s24 = smov (!%p171_p2), 127  }
   0x6   : > { %174 = sbr.rel (%p171_p2) target bundleno = 333 (0x14d), region = 36  ;;  %s691_s25 = smov (!%p171_p2), 2  }
   0x7   : > { %s692_s26 = smov (!%p171_p2), 1   ;;  %s693_s27 = smov (!%p171_p2), 126  }
   0xb   : > { %vm214_vm0 = vcmask 64512   ;;  %v689_v0 = vmov 0.0   ;;  %s900_s16 = smov (!%p199_p3, %s619_s16), 1  ;;  %vm218_vm1 = vcmask 60416   ;;  %vm228_vm2 = vcmask 60432   ;;  %v275_v6 = vld [vmem:[%s897_s3 + $0x8] sm:$0xff] }
   0xc   : > { %221 = vst.msk [vmem:[#allocation3 + $0x8] sm:$0xff] %vm214_vm0, %v689_v0  ;;  %s624_s17 = sshll.u32 %s900_s16, 2  ;;  %vm234_vm3 = vcmask 60424   ;;  %v694_v5 = vmov 0   ;;  %vm245_vm4 = vcmask 52224   ;;  %v277_v9 = vld [vmem:[%s897_s3 + $0x18] sm:$0xff] }
   0xd   : > { %215 = vst.msk [vmem:[#allocation2] sm:$0xff] %vm214_vm0, %v689_v0  ;;  %s206_s20 = scalar_lea.vmem %s895_s1, %s624_s17  ;;  %s202_s23 = scalar_lea.vmem %s894_s0, %s624_s17  ;;  %679 = vset.pattern.permute.xlu1 %v694_v5  ;;  %678 = vset.pattern.permute.xlu0 %v694_v5  ;;  %v274_v10 = vld [vmem:[%s897_s3] sm:$0xff]  ;;  %vm391_vm5 = vcmask 1043456   ;;  %vm260_vm6 = vcmask 44032   ;;  %v280_v15 = vld [vmem:[%s897_s3 + $0x30] sm:$0xff]  ;;  %v279_v16 = vld [vmem:[%s897_s3 + $0x28] sm:$0xff] }
   0xe   : > { %216 = vst.msk [vmem:[#allocation2 + $0x8] sm:$0xff] %vm214_vm0, %v689_v0  ;;  %v213_v1 = vld [vmem:[%s206_s20] sm:$0xf]  ;;  %680 = vset.pattern.permute.xlu2 %v694_v5  ;;  %vm354_vm7 = vcmask 228352   ;;  %v268_v21 = vld [vmem:[%s896_s2 + $0x30] sm:$0xff]  ;;  %v283_v27 = vld [vmem:[%s897_s3 + $0x48] sm:$0xff] }
   0xf   : > { %217 = vst.msk [vmem:[#allocation2 + $0x10] sm:$0xff] %vm214_vm0, %v689_v0  ;;  %v212_v2 = vld [vmem:[%s202_s23] sm:$0xf]  ;;  %247 = vrot.lane.b32.xlu0 %v213_v1, %s690_s24  ;;  %225 = vrot.lane.b32.xlu2 %v213_v1, %s691_s25  ;;  %v276_v26 = vld [vmem:[%s897_s3 + $0x10] sm:$0xff]  ;;  %s663_s28 = smul.u32 96, %s900_s16 }
  0x10   : > { %219 = vst.msk [vmem:[#allocation2 + $0x18] sm:$0xf] %vm218_vm1, %v689_v0  ;;  %242 = vrot.lane.b32.xlu1 %v212_v2, %s690_s24  ;;  %v262_v20 = vld [vmem:[%s896_s2] sm:$0xff]  ;;  %v263_v28 = vld [vmem:[%s896_s2 + $0x8] sm:$0xff]  ;;  %v269_v29 = vld [vmem:[%s896_s2 + $0x38] sm:$0xff] }
  0x11   : > { %220 = vst.msk [vmem:[#allocation3] sm:$0xff] %vm214_vm0, %v689_v0  ;;  %v282_v24 = vld [vmem:[%s897_s3 + $0x40] sm:$0xff]  ;;  %v285_v30 = vld [vmem:[%s897_s3 + $0x58] sm:$0xff]  ;;  %v264_v32 = vld [vmem:[%s896_s2 + $0x10] sm:$0xff]  ;;  %s859_s5 = scalar_lea.vmem %s898_s4, %s663_s28 }
  0x12   : > { %254 = vst.msk [vmem:[#allocation3 + $0xc] sm:$0xf] %vm218_vm1, %v213_v1  ;;  %v278_v31 = vld [vmem:[%s897_s3 + $0x20] sm:$0xff]  ;;  %v281_v34 = vld [vmem:[%s897_s3 + $0x38] sm:$0xff]  ;;  %v271_v36 = vld [vmem:[%s896_s2 + $0x48] sm:$0xff] }
  0x13   : > { %222 = vst.msk [vmem:[#allocation3 + $0x10] sm:$0xff] %vm214_vm0, %v689_v0  ;;  %v270_v33 = vld [vmem:[%s896_s2 + $0x40] sm:$0xff]  ;;  %v265_v35 = vld [vmem:[%s896_s2 + $0x18] sm:$0xff]  ;;  %v284_v37 = vld [vmem:[%s897_s3 + $0x50] sm:$0xff] }
  0x14   : > { %223 = vst.msk [vmem:[#allocation3 + $0x18] sm:$0xf] %vm218_vm1, %v689_v0  ;;  %v266_v38 = vld [vmem:[%s896_s2 + $0x20] sm:$0xff]  ;;  %v272_v39 = vld [vmem:[%s896_s2 + $0x50] sm:$0xff]  ;;  %v267_v40 = vld [vmem:[%s896_s2 + $0x28] sm:$0xff] }
  0x15   : > { %253 = vst.msk [vmem:[#allocation3 + $0x8] sm:$0xf] %vm218_vm1, %v212_v2  ;;  %v273_v41 = vld [vmem:[%s896_s2 + $0x58] sm:$0xff] }
  0x16   : > { %240 = vst.msk [vmem:[#allocation2 + $0xc] sm:$0xf] %vm218_vm1, %v212_v2 }
  0x17   : > { %241 = vst.msk [vmem:[#allocation2 + $0x10] sm:$0xf] %vm218_vm1, %v213_v1  ;;  %257 = vrot.lane.b32.xlu0 %v212_v2, %s693_s27  ;;  %231 = vrot.lane.b32.xlu2 %v212_v2, %s692_s26 }
  0x18   : > { %236 = vrot.lane.b32.xlu1 %v213_v1, %s692_s26 }
  0x1c   : > { %v291_v23 = vld [vmem:[#allocation3 + $0x8] sm:$0xff] }
  0x1f   : > { %296 = vperm.xlu0 %678, %v274_v10   ;;  %306 = vperm.xlu2 %680, %v276_v26  }
  0x20   : > { %301 = vperm.xlu1 %679, %v275_v6  }
  0x27   : > { %321 = vperm.xlu0 %678, %v279_v16   ;;  %316 = vperm.xlu2 %680, %v278_v31  }
  0x28   : > { %311 = vperm.xlu1 %679, %v277_v9  }
  0x2f   : > { %336 = vperm.xlu0 %678, %v282_v24   ;;  %331 = vperm.xlu2 %680, %v281_v34  }
  0x30   : > { %326 = vperm.xlu1 %679, %v280_v15  }
  0x37   : > { %351 = vperm.xlu0 %678, %v285_v30   ;;  %346 = vperm.xlu2 %680, %v284_v37  }
  0x38   : > { %341 = vperm.xlu1 %679, %v283_v27  }
  0x69   : > { %v226_v3 = vpop.permute.xlu2 %225 }
  0x6a   : > { %229 = vst.msk [vmem:[#allocation2] sm:$0xf] %vm228_vm2, %v226_v3 }
  0x71   : > { %v232_v4 = vpop.permute.xlu2 %231 }
  0x72   : > { %235 = vst.msk [vmem:[#allocation2 + $0x4] sm:$0xf] %vm234_vm3, %v232_v4 }
  0x73   : > { %251 = vst.msk [vmem:[#allocation3] sm:$0xf] %vm234_vm3, %v232_v4 }
  0x79   : > { %v286_v19 = vld [vmem:[#allocation2] sm:$0xff]  ;;  %v307_v43 = vpop.permute.xlu2 %306 }
  0x81   : > { %v248_v7 = vpop.permute.xlu0 %247  ;;  %v853_v48 = vpop.permute.xlu2 %316 }
  0x82   : > { %v243_v8 = vpop.permute.xlu1 %242  ;;  %250 = vst.msk [vmem:[#allocation2 + $0x18] sm:$0xf] %vm245_vm4, %v248_v7 }
  0x83   : > { %256 = vst.msk [vmem:[#allocation3 + $0x14] sm:$0xf] %vm245_vm4, %v248_v7 }
  0x84   : > { %246 = vst.msk [vmem:[#allocation2 + $0x14] sm:$0xf] %vm245_vm4, %v243_v8 }
  0x85   : > { %255 = vst.msk [vmem:[#allocation3 + $0x10] sm:$0xf] %vm245_vm4, %v243_v8 }
  0x89   : > { %v258_v12 = vpop.permute.xlu0 %257  ;;  %v289_v13 = vld [vmem:[#allocation2 + $0x18] sm:$0xf]  ;;  %v332_v0 = vpop.permute.xlu2 %331 }
  0x8a   : > { %v237_v11 = vpop.permute.xlu1 %236  ;;  %627 = vmatpush.msk.msra.mxu0 %vm391_vm5, %v289_v13  ;;  %655 = vmatpush.msk.msra.mxu2 %vm391_vm5, %v289_v13  ;;  %261 = vst.msk [vmem:[#allocation3 + $0x18] sm:$0xf] %vm260_vm6, %v258_v12 }
  0x8b   : > { %239 = vst.msk [vmem:[#allocation2 + $0x8] sm:$0xf] %vm234_vm3, %v237_v11  ;;  %v288_v14 = vld [vmem:[#allocation2 + $0x10] sm:$0xff] }
  0x8c   : > { %252 = vst.msk [vmem:[#allocation3 + $0x4] sm:$0xf] %vm234_vm3, %v237_v11  ;;  %408 = vmatpush.msra.mxu0 %v288_v14  ;;  %656 = vmatpush.msra.mxu2 %v288_v14  ;;  %v292_v22 = vld [vmem:[#allocation3 + $0x10] sm:$0xff] }
  0x91   : > { %v293_v18 = vld [vmem:[#allocation3 + $0x18] sm:$0xf]  ;;  %v297_v46 = vpop.permute.xlu0 %296 }
  0x92   : > { %v287_v17 = vld [vmem:[#allocation2 + $0x8] sm:$0xff]  ;;  %640 = vmatpush.msk.msra.mxu1 %vm391_vm5, %v293_v18  ;;  %659 = vmatpush.msk.msra.mxu3 %vm391_vm5, %v293_v18  ;;  %v302_v42 = vpop.permute.xlu1 %301 }
  0x93   : > { %409 = vmatpush.msra.mxu0 %v287_v17  ;;  %657 = vmatpush.msra.mxu2 %v287_v17  ;;  %v290_v25 = vld [vmem:[#allocation3] sm:$0xff] }
  0x94   : > { %476 = vmatpush.msra.mxu1 %v292_v22  ;;  %660 = vmatpush.msra.mxu3 %v292_v22 }
  0x95   : > { %410 = vmatpush.msra.mxu0 %v286_v19  ;;  %658 = vmatpush.msra.mxu2 %v286_v19 }
  0x96   : > { %628 = vmatmul.msk.f32.vlgmr.msra.gmra.mxu0 %vm354_vm7, %v262_v20  ;;  %634 = vmatmul.msk.f32.vlgmr.msra.gmra.mxu2 %vm354_vm7, %v268_v21 }
  0x97   : > { %477 = vmatpush.msra.mxu1 %v291_v23  ;;  %661 = vmatpush.msra.mxu3 %v291_v23 }
  0x99   : > { %478 = vmatpush.msra.mxu1 %v290_v25  ;;  %662 = vmatpush.msra.mxu3 %v290_v25  ;;  %v863_v61 = vpop.permute.xlu0 %321 }
  0x9a   : > { %641 = vmatmul.msk.f32.vlgmr.msra.gmra.mxu1 %vm354_vm7, %v262_v20  ;;  %647 = vmatmul.msk.f32.vlgmr.msra.gmra.mxu3 %vm354_vm7, %v268_v21  ;;  %v312_v44 = vpop.permute.xlu1 %311 }
  0x9e   : > { %629 = vmatmul.msk.f32.gmra.mxu0 %vm354_vm7, %v263_v28  ;;  %635 = vmatmul.msk.f32.gmra.mxu2 %vm354_vm7, %v269_v29 }
  0xa1   : > { %v337_v18 = vpop.permute.xlu0 %336 }
  0xa2   : > { %642 = vmatmul.msk.f32.gmra.mxu1 %vm354_vm7, %v263_v28  ;;  %648 = vmatmul.msk.f32.gmra.mxu3 %vm354_vm7, %v269_v29  ;;  %v327_v50 = vpop.permute.xlu1 %326 }
  0xa6   : > { %630 = vmatmul.msk.f32.gmra.mxu0 %vm354_vm7, %v264_v32  ;;  %636 = vmatmul.msk.f32.gmra.mxu2 %vm354_vm7, %v270_v33 }
  0xaa   : > { %643 = vmatmul.msk.f32.gmra.mxu1 %vm354_vm7, %v264_v32  ;;  %649 = vmatmul.msk.f32.gmra.mxu3 %vm354_vm7, %v270_v33 }
  0xae   : > { %631 = vmatmul.msk.f32.gmra.mxu0 %vm354_vm7, %v265_v35  ;;  %637 = vmatmul.msk.f32.gmra.mxu2 %vm354_vm7, %v271_v36 }
  0xb2   : > { %644 = vmatmul.msk.f32.gmra.mxu1 %vm354_vm7, %v265_v35  ;;  %650 = vmatmul.msk.f32.gmra.mxu3 %vm354_vm7, %v271_v36  ;;  %v342_v36 = vpop.permute.xlu1 %341 }
  0xb6   : > { %632 = vmatmul.msk.f32.gmra.mxu0 %vm354_vm7, %v266_v38  ;;  %638 = vmatmul.msk.f32.gmra.mxu2 %vm354_vm7, %v272_v39 }
  0xba   : > { %645 = vmatmul.msk.f32.gmra.mxu1 %vm354_vm7, %v266_v38  ;;  %651 = vmatmul.msk.f32.gmra.mxu3 %vm354_vm7, %v272_v39 }
  0xbe   : > { %633 = vmatmul.msk.f32.gmra.mxu0 %vm354_vm7, %v267_v40  ;;  %639 = vmatmul.msk.f32.gmra.mxu2 %vm354_vm7, %v273_v41 }
  0xc2   : > { %646 = vmatmul.msk.f32.gmra.mxu1 %vm354_vm7, %v267_v40  ;;  %652 = vmatmul.msk.f32.gmra.mxu3 %vm354_vm7, %v273_v41 }
 0x113   : > { %v412_v45 = vpop.f32.mrf.mxu0 }
 0x114   : > { %v413_v47 = vadd.f32 %v412_v45, %v297_v46 }
 0x116   : > { %v448_v51 = vmax.f32 %v413_v47, 0.0 }
 0x117   : > { %v480_v49 = vpop.f32.mrf.mxu1 }
 0x118   : > { %v481_v52 = vadd.f32 %v480_v49, %v297_v46 }
 0x119   : > { %v430_v53 = vpop.f32.mrf.mxu2 }
 0x11a   : > { %v516_v54 = vmax.f32 %v481_v52, 0.0  ;;  %v431_v55 = vadd.f32 %v430_v53, %v327_v50  ;;  %v347_v52 = vpop.permute.xlu2 %346 }
 0x11b   : > { %v415_v56 = vpop.f32.mrf.mxu0 }
 0x11c   : > { %v528_v57 = vmax.f32 %v448_v51, %v516_v54  ;;  %v416_v58 = vadd.f32 %v415_v56, %v302_v42  ;;  %v454_v60 = vmax.f32 %v431_v55, 0.0 }
 0x11d   : > { %v498_v59 = vpop.f32.mrf.mxu3 }
 0x11e   : > { %540 = vst.msk [vmem:[%s859_s5] sm:$0xff] %vm214_vm0, %v528_v57  ;;  %v499_v62 = vadd.f32 %v498_v59, %v327_v50  ;;  %v449_v1 = vmax.f32 %v416_v58, 0.0 }
 0x11f   : > { %v483_v63 = vpop.f32.mrf.mxu1 }
 0x120   : > { %v522_v2 = vmax.f32 %v499_v62, 0.0  ;;  %v484_v3 = vadd.f32 %v483_v63, %v302_v42 }
 0x121   : > { %v433_v4 = vpop.f32.mrf.mxu2 }
 0x122   : > { %v534_v5 = vmax.f32 %v454_v60, %v522_v2  ;;  %v517_v6 = vmax.f32 %v484_v3, 0.0  ;;  %v434_v7 = vadd.f32 %v433_v4, %v332_v0  ;;  %v352_v3 = vpop.permute.xlu0 %351 }
 0x123   : > { %v418_v8 = vpop.f32.mrf.mxu0 }
 0x124   : > { %546 = vst.msk [vmem:[%s859_s5 + $0x30] sm:$0xff] %vm214_vm0, %v534_v5  ;;  %v529_v9 = vmax.f32 %v449_v1, %v517_v6  ;;  %v419_v10 = vadd.f32 %v418_v8, %v307_v43  ;;  %v455_v12 = vmax.f32 %v434_v7, 0.0 }
 0x125   : > { %v501_v11 = vpop.f32.mrf.mxu3 }
 0x126   : > { %541 = vst.msk [vmem:[%s859_s5 + $0x8] sm:$0xff] %vm214_vm0, %v529_v9  ;;  %v502_v13 = vadd.f32 %v501_v11, %v332_v0  ;;  %v450_v15 = vmax.f32 %v419_v10, 0.0 }
 0x127   : > { %v486_v14 = vpop.f32.mrf.mxu1 }
 0x128   : > { %v523_v16 = vmax.f32 %v502_v13, 0.0  ;;  %v487_v17 = vadd.f32 %v486_v14, %v307_v43 }
 0x129   : > { %v436_v19 = vpop.f32.mrf.mxu2 }
 0x12a   : > { %v535_v20 = vmax.f32 %v455_v12, %v523_v16  ;;  %v518_v21 = vmax.f32 %v487_v17, 0.0  ;;  %v437_v22 = vadd.f32 %v436_v19, %v337_v18 }
 0x12b   : > { %v421_v23 = vpop.f32.mrf.mxu0 }
 0x12c   : > { %547 = vst.msk [vmem:[%s859_s5 + $0x38] sm:$0xff] %vm214_vm0, %v535_v20  ;;  %v530_v24 = vmax.f32 %v450_v15, %v518_v21  ;;  %v456_v26 = vmax.f32 %v437_v22, 0.0  ;;  %v422_v27 = vadd.f32 %v421_v23, %v312_v44 }
 0x12d   : > { %v504_v25 = vpop.f32.mrf.mxu3 }
 0x12e   : > { %542 = vst.msk [vmem:[%s859_s5 + $0x10] sm:$0xff] %vm214_vm0, %v530_v24  ;;  %v505_v28 = vadd.f32 %v504_v25, %v337_v18  ;;  %v451_v33 = vmax.f32 %v422_v27, 0.0 }
 0x12f   : > { %v489_v29 = vpop.f32.mrf.mxu1 }
 0x130   : > { %v524_v30 = vmax.f32 %v505_v28, 0.0  ;;  %v490_v31 = vadd.f32 %v489_v29, %v312_v44 }
 0x131   : > { %v439_v32 = vpop.f32.mrf.mxu2 }
 0x132   : > { %v536_v34 = vmax.f32 %v456_v26, %v524_v30  ;;  %v519_v35 = vmax.f32 %v490_v31, 0.0  ;;  %v440_v39 = vadd.f32 %v439_v32, %v342_v36 }
 0x133   : > { %v424_v37 = vpop.f32.mrf.mxu0 }
 0x134   : > { %548 = vst.msk [vmem:[%s859_s5 + $0x40] sm:$0xff] %vm214_vm0, %v536_v34  ;;  %v531_v38 = vmax.f32 %v451_v33, %v519_v35  ;;  %v425_v41 = vadd.f32 %v424_v37, %v853_v48  ;;  %v457_v44 = vmax.f32 %v440_v39, 0.0 }
 0x135   : > { %v507_v40 = vpop.f32.mrf.mxu3 }
 0x136   : > { %543 = vst.msk [vmem:[%s859_s5 + $0x18] sm:$0xff] %vm214_vm0, %v531_v38  ;;  %v508_v42 = vadd.f32 %v507_v40, %v342_v36  ;;  %v452_v49 = vmax.f32 %v425_v41, 0.0 }
 0x137   : > { %v492_v43 = vpop.f32.mrf.mxu1 }
 0x138   : > { %v525_v45 = vmax.f32 %v508_v42, 0.0  ;;  %v493_v46 = vadd.f32 %v492_v43, %v853_v48 }
 0x139   : > { %v442_v47 = vpop.f32.mrf.mxu2 }
 0x13a   : > { %v537_v50 = vmax.f32 %v457_v44, %v525_v45  ;;  %v520_v51 = vmax.f32 %v493_v46, 0.0  ;;  %v443_v55 = vadd.f32 %v442_v47, %v347_v52 }
 0x13b   : > { %v427_v53 = vpop.f32.mrf.mxu0 }
 0x13c   : > { %549 = vst.msk [vmem:[%s859_s5 + $0x48] sm:$0xff] %vm214_vm0, %v537_v50  ;;  %v532_v54 = vmax.f32 %v452_v49, %v520_v51  ;;  %v428_v57 = vadd.f32 %v427_v53, %v863_v61  ;;  %v458_v48 = vmax.f32 %v443_v55, 0.0 }
 0x13d   : > { %v510_v56 = vpop.f32.mrf.mxu3 }
 0x13e   : > { %544 = vst.msk [vmem:[%s859_s5 + $0x20] sm:$0xff] %vm214_vm0, %v532_v54  ;;  %v511_v58 = vadd.f32 %v510_v56, %v347_v52  ;;  %v453_v0 = vmax.f32 %v428_v57, 0.0 }
 0x13f   : > { %v495_v59 = vpop.f32.mrf.mxu1 }
 0x140   : > { %v526_v60 = vmax.f32 %v511_v58, 0.0  ;;  %v496_v62 = vadd.f32 %v495_v59, %v863_v61 }
 0x141   : > { %v445_v63 = vpop.f32.mrf.mxu2 }
 0x142   : > { %v538_v1 = vmax.f32 %v458_v48, %v526_v60  ;;  %v521_v2 = vmax.f32 %v496_v62, 0.0  ;;  %v446_v5 = vadd.f32 %v445_v63, %v352_v3 }
 0x144   : > { %550 = vst.msk [vmem:[%s859_s5 + $0x50] sm:$0xff] %vm214_vm0, %v538_v1  ;;  %v533_v4 = vmax.f32 %v453_v0, %v521_v2  ;;  %v459_v8 = vmax.f32 %v446_v5, 0.0 }
 0x145   : > { %v513_v6 = vpop.f32.mrf.mxu3 }
 0x146   : > { %545 = vst.msk [vmem:[%s859_s5 + $0x28] sm:$0xff] %vm214_vm0, %v533_v4  ;;  %v514_v7 = vadd.f32 %v513_v6, %v352_v3 }
 0x148   : > { %v527_v9 = vmax.f32 %v514_v7, 0.0 }
 0x14a   : > { %v539_v10 = vmax.f32 %v459_v8, %v527_v9 }
 0x14c   : > { %551 = vst.msk [vmem:[%s859_s5 + $0x58] sm:$0xff] %vm214_vm0, %v539_v10 }
 0x14d PF: > { %s14_s15 = sadd.s32 1, %s687_s15  }
 0x14e   : > { %p11_p4 = scmp.ge.s32.totalorder %s14_s15, 4  }
 0x150   :  { %13 = sbr.rel (!%p11_p4) target bundleno = 1 (0x1), region = 69 }

</bundles_post_ra>
